<compile_context>
chip_gen: v5e
topology: v5e:2x2
jax: 0.10.0
libtpu: 0.0.40
codegen_flags: <defaults>
</compile_context>

<pallas_src>
import functools

import jax
import jax.numpy as jnp
from jax import lax
from jax.experimental import pallas as pl
from jax.experimental.pallas import tpu as pltpu


def _conv_fused_kernel(x_ref, w_ref, b_ref, o_ref, pad_ref, stack_ref,
                       *, K, H, W, Wp, HWp, Bt, c_in):
    # x_ref:     (Bt, C_in, H*W)        unpadded, spatially-flattened bf16 input
    # w_ref:     (C_out, K*K*C_in)      fused bf16 weight tile
    # b_ref:     (C_out, 1)             f32 bias
    # o_ref:     (Bt, C_out, H*W)       W-dense f32 output
    # pad_ref:   (Bt, C_in, L_pad)      VMEM scratch: zero-padded flat input
    # stack_ref: (K*K*C_in, Bt*HWp)     VMEM scratch: fused im2col-style operand
    p = K // 2

    # 1) Build the zero-padded, flattened input in VMEM (in-kernel padding).
    pad_ref[...] = jnp.zeros_like(pad_ref)
    for b in range(Bt):
        for i in range(H):
            dst = (p + i) * Wp + p
            pad_ref[b, :, dst:dst + W] = x_ref[b, :, i * W:(i + 1) * W]

    # 2) Stack the K*K shifted slices into one fused operand (read slices off
    #    the scratch ref per tap; the full padded image is never held live in
    #    vregs).
    for b in range(Bt):
        col = b * HWp
        for di in range(K):
            for dj in range(K):
                t = di * K + dj
                s = di * Wp + dj
                stack_ref[t * c_in:(t + 1) * c_in, col:col + HWp] = \
                    pad_ref[b, :, s:s + HWp]

    # 3) Single MXU contraction over K*K*C_in with f32 accumulation, plus bias.
    acc = jnp.dot(w_ref[...], stack_ref[...],
                  preferred_element_type=jnp.float32)
    acc = acc + b_ref[...]                     # (C_out, Bt*HWp), bias over lanes

    # 4) Compact Wp-strided rows into W-dense output rows (drops the halo
    #    columns in-kernel; the output block is lane-dense and needs no
    #    wrapper-side slice).
    for b in range(Bt):
        base = b * HWp
        for i in range(H):
            o_ref[b, :, i * W:(i + 1) * W] = \
                acc[:, base + i * Wp: base + i * Wp + W].astype(o_ref.dtype)


def local_linear_cond_net(h, weight, bias, x=None, *, batch_tile=None):
    """Conv2d(C_in, C_out, K, padding=K//2) applied to h (NCHW).

    `x` is accepted and ignored, matching LocalLinearCondNet.forward(h, x=None).
    Returns (bs, C_out, H, W) float32.  Operands are cast to bf16 for the MXU;
    accumulation is f32.
    """
    del x  # unused by the module
    bs, c_in, H, W = h.shape
    c_out, c_in_w, K, K2 = weight.shape
    assert c_in_w == c_in and K == K2
    # TODO(synk): even kernel_size (PyTorch's asymmetric "same" padding) not supported.
    assert K % 2 == 1, "only odd kernel_size supported"

    p = K // 2
    Wp = W + 2 * p
    Hp = H + 2 * p
    HWp = H * Wp                    # flat span (padded-row stride) the matmul produces
    HW = H * W
    KKC = K * K * c_in
    L_pad = Hp * Wp + (K - 1)       # flat padded length so every tap slice is in bounds

    # Batch tile: keep >=2 grid steps when bs>=2 (v7x megacore), pack several
    # elements per step for larger batches to amortize per-step overhead.
    if batch_tile is None:
        batch_tile = 1
        for cand in (8, 4, 2):
            if bs % cand == 0 and bs // cand >= 2:
                batch_tile = cand
                break
    assert bs % batch_tile == 0, "bs must be divisible by batch_tile"
    Bt = batch_tile

    # bf16 operands for the MXU; no wrapper-side padding — just a free reshape.
    h_flat = h.reshape(bs, c_in, HW).astype(jnp.bfloat16)
    # (C_out, C_in, K, K) -> (C_out, K*K*C_in); column order (di, dj, c) matches
    # the in-kernel tap stacking order.
    w_fused = jnp.transpose(weight, (0, 2, 3, 1)).reshape(c_out, KKC).astype(jnp.bfloat16)
    b2 = bias.reshape(c_out, 1).astype(jnp.float32)

    kern = functools.partial(_conv_fused_kernel, K=K, H=H, W=W, Wp=Wp,
                             HWp=HWp, Bt=Bt, c_in=c_in)

    out = pl.pallas_call(
        kern,
        out_shape=jax.ShapeDtypeStruct((bs, c_out, HW), jnp.float32),
        grid_spec=pltpu.PrefetchScalarGridSpec(
            num_scalar_prefetch=0,
            grid=(bs // Bt,),
            in_specs=[
                pl.BlockSpec((Bt, c_in, HW), lambda b: (b, 0, 0)),
                pl.BlockSpec((c_out, KKC), lambda b: (0, 0)),
                pl.BlockSpec((c_out, 1), lambda b: (0, 0)),
            ],
            out_specs=pl.BlockSpec((Bt, c_out, HW), lambda b: (b, 0, 0)),
            scratch_shapes=[
                pltpu.VMEM((Bt, c_in, L_pad), jnp.bfloat16),
                pltpu.VMEM((KKC, Bt * HWp), jnp.bfloat16),
            ],
        ),
        compiler_params=pltpu.CompilerParams(
            dimension_semantics=("parallel",)),
    )(h_flat, w_fused, b2)

    # Free contiguous reshape; no slice / extra HBM round trip on the output.
    return out.reshape(bs, c_out, H, W)


def _reference(h, weight, bias, cast=None):
    """Pure-JAX reference mirroring nn.Conv2d(C_in, C_out, K, padding=K//2)."""
    K = weight.shape[-1]
    p = K // 2
    hh = h if cast is None else h.astype(cast)
    ww = weight if cast is None else weight.astype(cast)
    out = lax.conv_general_dilated(
        hh, ww, window_strides=(1, 1), padding=((p, p), (p, p)),
        dimension_numbers=("NCHW", "OIHW", "NCHW"),
        preferred_element_type=jnp.float32)
    return out + bias[None, :, None, None]


if __name__ == "__main__":
    bs, C_in, C_out, H, W, K = 2, 4, 8, 16, 16, 3

    key0 = jax.random.PRNGKey(0)
    k_h, k_w, k_b = jax.random.split(key0, 3)

    h = jax.random.normal(k_h, (bs, C_in, H, W), jnp.float32)
    weight = jax.random.normal(k_w, (C_out, C_in, K, K), jnp.float32) / jnp.sqrt(C_in * K * K)
    bias = 0.1 * jax.random.normal(k_b, (C_out,), jnp.float32)

    out = jax.block_until_ready(local_linear_cond_net(h, weight, bias))
    assert out.shape == (bs, C_out, H, W)

    # Tight check vs. a reference with identically bf16-cast operands
    # (only f32 accumulation-order differences remain).
    ref_bf16 = _reference(h, weight, bias, cast=jnp.bfloat16)
    err_bf16 = float(jnp.max(jnp.abs(out - ref_bf16)))
    assert err_bf16 < 2e-3, f"mismatch vs bf16 reference: {err_bf16}"

    # Loose sanity check vs. the full-f32 Conv2d reference (bf16 input rounding).
    ref_f32 = _reference(h, weight, bias, cast=None)
    err_f32 = float(jnp.max(jnp.abs(out - ref_f32)))
    assert err_f32 < 5e-2, f"mismatch vs f32 reference: {err_f32}"

    print("KERNEL_OK")
</pallas_src>

<mosaic_0001>
module attributes {stable_mosaic.version = 11 : i64} {
  func.func @_conv_fused_kernel(%arg0: i32, %arg1: memref<1x4x256xbf16, #tpu.memory_space<vmem>>, %arg2: memref<8x36xbf16, #tpu.memory_space<vmem>>, %arg3: memref<8x1xf32, #tpu.memory_space<vmem>>, %arg4: memref<1x8x256xf32, #tpu.memory_space<vmem>>, %arg5: memref<1x4x326xbf16, #tpu.memory_space<vmem>>, %arg6: memref<36x288xbf16, #tpu.memory_space<vmem>>) attributes {dimension_semantics = [#tpu.dimension_semantics<parallel>], iteration_bounds = array<i64: 2>, scalar_prefetch = 0 : i64, scratch_operands = 2 : i64, tpu.core_type = #tpu.core_type<tc>, window_params = [{transform_indices = @transform_0, window_bounds = array<i64: 1, 4, 256>}, {pipeline_mode = #tpu.pipeline_mode<synchronous>, transform_indices = @transform_1, window_bounds = array<i64: 8, 36>}, {pipeline_mode = #tpu.pipeline_mode<synchronous>, transform_indices = @transform_2, window_bounds = array<i64: 8, 1>}, {transform_indices = @transform_3, window_bounds = array<i64: 1, 8, 256>}]} {
    %cst = arith.constant 0.000000e+00 : bf16
    %0 = vector.broadcast %cst : bf16 to vector<1x4x326xbf16>
    %c0 = arith.constant 0 : index
    %c0_0 = arith.constant 0 : index
    %c0_1 = arith.constant 0 : index
    %1 = vector.load %arg5[%c0, %c0_0, %c0_1] : memref<1x4x326xbf16, #tpu.memory_space<vmem>>, vector<1x4x326xbf16>
    tpu.vector_store %arg5[%c0, %c0_0, %c0_1], %0 {strides = array<i32>} : memref<1x4x326xbf16, #tpu.memory_space<vmem>>, vector<1x4x326xbf16>,
    %c0_2 = arith.constant 0 : index
    %c0_3 = arith.constant 0 : index
    %c0_4 = arith.constant 0 : index
    %2 = vector.load %arg1[%c0_2, %c0_3, %c0_4] : memref<1x4x256xbf16, #tpu.memory_space<vmem>>, vector<1x4x16xbf16>
    %3 = vector.shape_cast %2 : vector<1x4x16xbf16> to vector<4x16xbf16>
    %c0_5 = arith.constant 0 : index
    %c0_6 = arith.constant 0 : index
    %c19 = arith.constant 19 : index
    %4 = vector.load %arg5[%c0_5, %c0_6, %c19] : memref<1x4x326xbf16, #tpu.memory_space<vmem>>, vector<1x4x16xbf16>
    %5 = vector.shape_cast %4 : vector<1x4x16xbf16> to vector<4x16xbf16>
    %6 = vector.shape_cast %3 : vector<4x16xbf16> to vector<1x4x16xbf16>
    tpu.vector_store %arg5[%c0_5, %c0_6, %c19], %6 {strides = array<i32>} : memref<1x4x326xbf16, #tpu.memory_space<vmem>>, vector<1x4x16xbf16>,
    %c0_7 = arith.constant 0 : index
    %c0_8 = arith.constant 0 : index
    %c16 = arith.constant 16 : index
    %7 = vector.load %arg1[%c0_7, %c0_8, %c16] : memref<1x4x256xbf16, #tpu.memory_space<vmem>>, vector<1x4x16xbf16>
    %8 = vector.shape_cast %7 : vector<1x4x16xbf16> to vector<4x16xbf16>
    %c0_9 = arith.constant 0 : index
    %c0_10 = arith.constant 0 : index
    %c37 = arith.constant 37 : index
    %9 = vector.load %arg5[%c0_9, %c0_10, %c37] : memref<1x4x326xbf16, #tpu.memory_space<vmem>>, vector<1x4x16xbf16>
    %10 = vector.shape_cast %9 : vector<1x4x16xbf16> to vector<4x16xbf16>
    %11 = vector.shape_cast %8 : vector<4x16xbf16> to vector<1x4x16xbf16>
    tpu.vector_store %arg5[%c0_9, %c0_10, %c37], %11 {strides = array<i32>} : memref<1x4x326xbf16, #tpu.memory_space<vmem>>, vector<1x4x16xbf16>,
    %c0_11 = arith.constant 0 : index
    %c0_12 = arith.constant 0 : index
    %c32 = arith.constant 32 : index
    %12 = vector.load %arg1[%c0_11, %c0_12, %c32] : memref<1x4x256xbf16, #tpu.memory_space<vmem>>, vector<1x4x16xbf16>
    %13 = vector.shape_cast %12 : vector<1x4x16xbf16> to vector<4x16xbf16>
    %c0_13 = arith.constant 0 : index
    %c0_14 = arith.constant 0 : index
    %c55 = arith.constant 55 : index
    %14 = vector.load %arg5[%c0_13, %c0_14, %c55] : memref<1x4x326xbf16, #tpu.memory_space<vmem>>, vector<1x4x16xbf16>
    %15 = vector.shape_cast %14 : vector<1x4x16xbf16> to vector<4x16xbf16>
    %16 = vector.shape_cast %13 : vector<4x16xbf16> to vector<1x4x16xbf16>
    tpu.vector_store %arg5[%c0_13, %c0_14, %c55], %16 {strides = array<i32>} : memref<1x4x326xbf16, #tpu.memory_space<vmem>>, vector<1x4x16xbf16>,
    %c0_15 = arith.constant 0 : index
    %c0_16 = arith.constant 0 : index
    %c48 = arith.constant 48 : index
    %17 = vector.load %arg1[%c0_15, %c0_16, %c48] : memref<1x4x256xbf16, #tpu.memory_space<vmem>>, vector<1x4x16xbf16>
    %18 = vector.shape_cast %17 : vector<1x4x16xbf16> to vector<4x16xbf16>
    %c0_17 = arith.constant 0 : index
    %c0_18 = arith.constant 0 : index
    %c73 = arith.constant 73 : index
    %19 = vector.load %arg5[%c0_17, %c0_18, %c73] : memref<1x4x326xbf16, #tpu.memory_space<vmem>>, vector<1x4x16xbf16>
    %20 = vector.shape_cast %19 : vector<1x4x16xbf16> to vector<4x16xbf16>
    %21 = vector.shape_cast %18 : vector<4x16xbf16> to vector<1x4x16xbf16>
    tpu.vector_store %arg5[%c0_17, %c0_18, %c73], %21 {strides = array<i32>} : memref<1x4x326xbf16, #tpu.memory_space<vmem>>, vector<1x4x16xbf16>,
    %c0_19 = arith.constant 0 : index
    %c0_20 = arith.constant 0 : index
    %c64 = arith.constant 64 : index
    %22 = vector.load %arg1[%c0_19, %c0_20, %c64] : memref<1x4x256xbf16, #tpu.memory_space<vmem>>, vector<1x4x16xbf16>
    %23 = vector.shape_cast %22 : vector<1x4x16xbf16> to vector<4x16xbf16>
    %c0_21 = arith.constant 0 : index
    %c0_22 = arith.constant 0 : index
    %c91 = arith.constant 91 : index
    %24 = vector.load %arg5[%c0_21, %c0_22, %c91] : memref<1x4x326xbf16, #tpu.memory_space<vmem>>, vector<1x4x16xbf16>
    %25 = vector.shape_cast %24 : vector<1x4x16xbf16> to vector<4x16xbf16>
    %26 = vector.shape_cast %23 : vector<4x16xbf16> to vector<1x4x16xbf16>
    tpu.vector_store %arg5[%c0_21, %c0_22, %c91], %26 {strides = array<i32>} : memref<1x4x326xbf16, #tpu.memory_space<vmem>>, vector<1x4x16xbf16>,
    %c0_23 = arith.constant 0 : index
    %c0_24 = arith.constant 0 : index
    %c80 = arith.constant 80 : index
    %27 = vector.load %arg1[%c0_23, %c0_24, %c80] : memref<1x4x256xbf16, #tpu.memory_space<vmem>>, vector<1x4x16xbf16>
    %28 = vector.shape_cast %27 : vector<1x4x16xbf16> to vector<4x16xbf16>
    %c0_25 = arith.constant 0 : index
    %c0_26 = arith.constant 0 : index
    %c109 = arith.constant 109 : index
    %29 = vector.load %arg5[%c0_25, %c0_26, %c109] : memref<1x4x326xbf16, #tpu.memory_space<vmem>>, vector<1x4x16xbf16>
    %30 = vector.shape_cast %29 : vector<1x4x16xbf16> to vector<4x16xbf16>
    %31 = vector.shape_cast %28 : vector<4x16xbf16> to vector<1x4x16xbf16>
    tpu.vector_store %arg5[%c0_25, %c0_26, %c109], %31 {strides = array<i32>} : memref<1x4x326xbf16, #tpu.memory_space<vmem>>, vector<1x4x16xbf16>,
    %c0_27 = arith.constant 0 : index
    %c0_28 = arith.constant 0 : index
    %c96 = arith.constant 96 : index
    %32 = vector.load %arg1[%c0_27, %c0_28, %c96] : memref<1x4x256xbf16, #tpu.memory_space<vmem>>, vector<1x4x16xbf16>
    %33 = vector.shape_cast %32 : vector<1x4x16xbf16> to vector<4x16xbf16>
    %c0_29 = arith.constant 0 : index
    %c0_30 = arith.constant 0 : index
    %c127 = arith.constant 127 : index
    %34 = vector.load %arg5[%c0_29, %c0_30, %c127] : memref<1x4x326xbf16, #tpu.memory_space<vmem>>, vector<1x4x16xbf16>
    %35 = vector.shape_cast %34 : vector<1x4x16xbf16> to vector<4x16xbf16>
    %36 = vector.shape_cast %33 : vector<4x16xbf16> to vector<1x4x16xbf16>
    tpu.vector_store %arg5[%c0_29, %c0_30, %c127], %36 {strides = array<i32>} : memref<1x4x326xbf16, #tpu.memory_space<vmem>>, vector<1x4x16xbf16>,
    %c0_31 = arith.constant 0 : index
    %c0_32 = arith.constant 0 : index
    %c112 = arith.constant 112 : index
    %37 = vector.load %arg1[%c0_31, %c0_32, %c112] : memref<1x4x256xbf16, #tpu.memory_space<vmem>>, vector<1x4x16xbf16>
    %38 = vector.shape_cast %37 : vector<1x4x16xbf16> to vector<4x16xbf16>
    %c0_33 = arith.constant 0 : index
    %c0_34 = arith.constant 0 : index
    %c145 = arith.constant 145 : index
    %39 = vector.load %arg5[%c0_33, %c0_34, %c145] : memref<1x4x326xbf16, #tpu.memory_space<vmem>>, vector<1x4x16xbf16>
    %40 = vector.shape_cast %39 : vector<1x4x16xbf16> to vector<4x16xbf16>
    %41 = vector.shape_cast %38 : vector<4x16xbf16> to vector<1x4x16xbf16>
    tpu.vector_store %arg5[%c0_33, %c0_34, %c145], %41 {strides = array<i32>} : memref<1x4x326xbf16, #tpu.memory_space<vmem>>, vector<1x4x16xbf16>,
    %c0_35 = arith.constant 0 : index
    %c0_36 = arith.constant 0 : index
    %c128 = arith.constant 128 : index
    %42 = vector.load %arg1[%c0_35, %c0_36, %c128] : memref<1x4x256xbf16, #tpu.memory_space<vmem>>, vector<1x4x16xbf16>
    %43 = vector.shape_cast %42 : vector<1x4x16xbf16> to vector<4x16xbf16>
    %c0_37 = arith.constant 0 : index
    %c0_38 = arith.constant 0 : index
    %c163 = arith.constant 163 : index
    %44 = vector.load %arg5[%c0_37, %c0_38, %c163] : memref<1x4x326xbf16, #tpu.memory_space<vmem>>, vector<1x4x16xbf16>
    %45 = vector.shape_cast %44 : vector<1x4x16xbf16> to vector<4x16xbf16>
    %46 = vector.shape_cast %43 : vector<4x16xbf16> to vector<1x4x16xbf16>
    tpu.vector_store %arg5[%c0_37, %c0_38, %c163], %46 {strides = array<i32>} : memref<1x4x326xbf16, #tpu.memory_space<vmem>>, vector<1x4x16xbf16>,
    %c0_39 = arith.constant 0 : index
    %c0_40 = arith.constant 0 : index
    %c144 = arith.constant 144 : index
    %47 = vector.load %arg1[%c0_39, %c0_40, %c144] : memref<1x4x256xbf16, #tpu.memory_space<vmem>>, vector<1x4x16xbf16>
    %48 = vector.shape_cast %47 : vector<1x4x16xbf16> to vector<4x16xbf16>
    %c0_41 = arith.constant 0 : index
    %c0_42 = arith.constant 0 : index
    %c181 = arith.constant 181 : index
    %49 = vector.load %arg5[%c0_41, %c0_42, %c181] : memref<1x4x326xbf16, #tpu.memory_space<vmem>>, vector<1x4x16xbf16>
    %50 = vector.shape_cast %49 : vector<1x4x16xbf16> to vector<4x16xbf16>
    %51 = vector.shape_cast %48 : vector<4x16xbf16> to vector<1x4x16xbf16>
    tpu.vector_store %arg5[%c0_41, %c0_42, %c181], %51 {strides = array<i32>} : memref<1x4x326xbf16, #tpu.memory_space<vmem>>, vector<1x4x16xbf16>,
    %c0_43 = arith.constant 0 : index
    %c0_44 = arith.constant 0 : index
    %c160 = arith.constant 160 : index
    %52 = vector.load %arg1[%c0_43, %c0_44, %c160] : memref<1x4x256xbf16, #tpu.memory_space<vmem>>, vector<1x4x16xbf16>
    %53 = vector.shape_cast %52 : vector<1x4x16xbf16> to vector<4x16xbf16>
    %c0_45 = arith.constant 0 : index
    %c0_46 = arith.constant 0 : index
    %c199 = arith.constant 199 : index
    %54 = vector.load %arg5[%c0_45, %c0_46, %c199] : memref<1x4x326xbf16, #tpu.memory_space<vmem>>, vector<1x4x16xbf16>
    %55 = vector.shape_cast %54 : vector<1x4x16xbf16> to vector<4x16xbf16>
    %56 = vector.shape_cast %53 : vector<4x16xbf16> to vector<1x4x16xbf16>
    tpu.vector_store %arg5[%c0_45, %c0_46, %c199], %56 {strides = array<i32>} : memref<1x4x326xbf16, #tpu.memory_space<vmem>>, vector<1x4x16xbf16>,
    %c0_47 = arith.constant 0 : index
    %c0_48 = arith.constant 0 : index
    %c176 = arith.constant 176 : index
    %57 = vector.load %arg1[%c0_47, %c0_48, %c176] : memref<1x4x256xbf16, #tpu.memory_space<vmem>>, vector<1x4x16xbf16>
    %58 = vector.shape_cast %57 : vector<1x4x16xbf16> to vector<4x16xbf16>
    %c0_49 = arith.constant 0 : index
    %c0_50 = arith.constant 0 : index
    %c217 = arith.constant 217 : index
    %59 = vector.load %arg5[%c0_49, %c0_50, %c217] : memref<1x4x326xbf16, #tpu.memory_space<vmem>>, vector<1x4x16xbf16>
    %60 = vector.shape_cast %59 : vector<1x4x16xbf16> to vector<4x16xbf16>
    %61 = vector.shape_cast %58 : vector<4x16xbf16> to vector<1x4x16xbf16>
    tpu.vector_store %arg5[%c0_49, %c0_50, %c217], %61 {strides = array<i32>} : memref<1x4x326xbf16, #tpu.memory_space<vmem>>, vector<1x4x16xbf16>,
    %c0_51 = arith.constant 0 : index
    %c0_52 = arith.constant 0 : index
    %c192 = arith.constant 192 : index
    %62 = vector.load %arg1[%c0_51, %c0_52, %c192] : memref<1x4x256xbf16, #tpu.memory_space<vmem>>, vector<1x4x16xbf16>
    %63 = vector.shape_cast %62 : vector<1x4x16xbf16> to vector<4x16xbf16>
    %c0_53 = arith.constant 0 : index
    %c0_54 = arith.constant 0 : index
    %c235 = arith.constant 235 : index
    %64 = vector.load %arg5[%c0_53, %c0_54, %c235] : memref<1x4x326xbf16, #tpu.memory_space<vmem>>, vector<1x4x16xbf16>
    %65 = vector.shape_cast %64 : vector<1x4x16xbf16> to vector<4x16xbf16>
    %66 = vector.shape_cast %63 : vector<4x16xbf16> to vector<1x4x16xbf16>
    tpu.vector_store %arg5[%c0_53, %c0_54, %c235], %66 {strides = array<i32>} : memref<1x4x326xbf16, #tpu.memory_space<vmem>>, vector<1x4x16xbf16>,
    %c0_55 = arith.constant 0 : index
    %c0_56 = arith.constant 0 : index
    %c208 = arith.constant 208 : index
    %67 = vector.load %arg1[%c0_55, %c0_56, %c208] : memref<1x4x256xbf16, #tpu.memory_space<vmem>>, vector<1x4x16xbf16>
    %68 = vector.shape_cast %67 : vector<1x4x16xbf16> to vector<4x16xbf16>
    %c0_57 = arith.constant 0 : index
    %c0_58 = arith.constant 0 : index
    %c253 = arith.constant 253 : index
    %69 = vector.load %arg5[%c0_57, %c0_58, %c253] : memref<1x4x326xbf16, #tpu.memory_space<vmem>>, vector<1x4x16xbf16>
    %70 = vector.shape_cast %69 : vector<1x4x16xbf16> to vector<4x16xbf16>
    %71 = vector.shape_cast %68 : vector<4x16xbf16> to vector<1x4x16xbf16>
    tpu.vector_store %arg5[%c0_57, %c0_58, %c253], %71 {strides = array<i32>} : memref<1x4x326xbf16, #tpu.memory_space<vmem>>, vector<1x4x16xbf16>,
    %c0_59 = arith.constant 0 : index
    %c0_60 = arith.constant 0 : index
    %c224 = arith.constant 224 : index
    %72 = vector.load %arg1[%c0_59, %c0_60, %c224] : memref<1x4x256xbf16, #tpu.memory_space<vmem>>, vector<1x4x16xbf16>
    %73 = vector.shape_cast %72 : vector<1x4x16xbf16> to vector<4x16xbf16>
    %c0_61 = arith.constant 0 : index
    %c0_62 = arith.constant 0 : index
    %c271 = arith.constant 271 : index
    %74 = vector.load %arg5[%c0_61, %c0_62, %c271] : memref<1x4x326xbf16, #tpu.memory_space<vmem>>, vector<1x4x16xbf16>
    %75 = vector.shape_cast %74 : vector<1x4x16xbf16> to vector<4x16xbf16>
    %76 = vector.shape_cast %73 : vector<4x16xbf16> to vector<1x4x16xbf16>
    tpu.vector_store %arg5[%c0_61, %c0_62, %c271], %76 {strides = array<i32>} : memref<1x4x326xbf16, #tpu.memory_space<vmem>>, vector<1x4x16xbf16>,
    %c0_63 = arith.constant 0 : index
    %c0_64 = arith.constant 0 : index
    %c240 = arith.constant 240 : index
    %77 = vector.load %arg1[%c0_63, %c0_64, %c240] : memref<1x4x256xbf16, #tpu.memory_space<vmem>>, vector<1x4x16xbf16>
    %78 = vector.shape_cast %77 : vector<1x4x16xbf16> to vector<4x16xbf16>
    %c0_65 = arith.constant 0 : index
    %c0_66 = arith.constant 0 : index
    %c289 = arith.constant 289 : index
    %79 = vector.load %arg5[%c0_65, %c0_66, %c289] : memref<1x4x326xbf16, #tpu.memory_space<vmem>>, vector<1x4x16xbf16>
    %80 = vector.shape_cast %79 : vector<1x4x16xbf16> to vector<4x16xbf16>
    %81 = vector.shape_cast %78 : vector<4x16xbf16> to vector<1x4x16xbf16>
    tpu.vector_store %arg5[%c0_65, %c0_66, %c289], %81 {strides = array<i32>} : memref<1x4x326xbf16, #tpu.memory_space<vmem>>, vector<1x4x16xbf16>,
    %c0_67 = arith.constant 0 : index
    %c0_68 = arith.constant 0 : index
    %c0_69 = arith.constant 0 : index
    %82 = vector.load %arg5[%c0_67, %c0_68, %c0_69] : memref<1x4x326xbf16, #tpu.memory_space<vmem>>, vector<1x4x288xbf16>
    %83 = vector.shape_cast %82 : vector<1x4x288xbf16> to vector<4x288xbf16>
    %c0_70 = arith.constant 0 : index
    %c0_71 = arith.constant 0 : index
    %84 = vector.load %arg6[%c0_70, %c0_71] : memref<36x288xbf16, #tpu.memory_space<vmem>>, vector<4x288xbf16>
    tpu.vector_store %arg6[%c0_70, %c0_71], %83 {strides = array<i32>} : memref<36x288xbf16, #tpu.memory_space<vmem>>, vector<4x288xbf16>,
    %c0_72 = arith.constant 0 : index
    %c0_73 = arith.constant 0 : index
    %c1 = arith.constant 1 : index
    %85 = vector.load %arg5[%c0_72, %c0_73, %c1] : memref<1x4x326xbf16, #tpu.memory_space<vmem>>, vector<1x4x288xbf16>
    %86 = vector.shape_cast %85 : vector<1x4x288xbf16> to vector<4x288xbf16>
    %c4 = arith.constant 4 : index
    %c0_74 = arith.constant 0 : index
    %87 = vector.load %arg6[%c4, %c0_74] : memref<36x288xbf16, #tpu.memory_space<vmem>>, vector<4x288xbf16>
    tpu.vector_store %arg6[%c4, %c0_74], %86 {strides = array<i32>} : memref<36x288xbf16, #tpu.memory_space<vmem>>, vector<4x288xbf16>,
    %c0_75 = arith.constant 0 : index
    %c0_76 = arith.constant 0 : index
    %c2 = arith.constant 2 : index
    %88 = vector.load %arg5[%c0_75, %c0_76, %c2] : memref<1x4x326xbf16, #tpu.memory_space<vmem>>, vector<1x4x288xbf16>
    %89 = vector.shape_cast %88 : vector<1x4x288xbf16> to vector<4x288xbf16>
    %c8 = arith.constant 8 : index
    %c0_77 = arith.constant 0 : index
    %90 = vector.load %arg6[%c8, %c0_77] : memref<36x288xbf16, #tpu.memory_space<vmem>>, vector<4x288xbf16>
    tpu.vector_store %arg6[%c8, %c0_77], %89 {strides = array<i32>} : memref<36x288xbf16, #tpu.memory_space<vmem>>, vector<4x288xbf16>,
    %c0_78 = arith.constant 0 : index
    %c0_79 = arith.constant 0 : index
    %c18 = arith.constant 18 : index
    %91 = vector.load %arg5[%c0_78, %c0_79, %c18] : memref<1x4x326xbf16, #tpu.memory_space<vmem>>, vector<1x4x288xbf16>
    %92 = vector.shape_cast %91 : vector<1x4x288xbf16> to vector<4x288xbf16>
    %c12 = arith.constant 12 : index
    %c0_80 = arith.constant 0 : index
    %93 = vector.load %arg6[%c12, %c0_80] : memref<36x288xbf16, #tpu.memory_space<vmem>>, vector<4x288xbf16>
    tpu.vector_store %arg6[%c12, %c0_80], %92 {strides = array<i32>} : memref<36x288xbf16, #tpu.memory_space<vmem>>, vector<4x288xbf16>,
    %c0_81 = arith.constant 0 : index
    %c0_82 = arith.constant 0 : index
    %c19_83 = arith.constant 19 : index
    %94 = vector.load %arg5[%c0_81, %c0_82, %c19_83] : memref<1x4x326xbf16, #tpu.memory_space<vmem>>, vector<1x4x288xbf16>
    %95 = vector.shape_cast %94 : vector<1x4x288xbf16> to vector<4x288xbf16>
    %c16_84 = arith.constant 16 : index
    %c0_85 = arith.constant 0 : index
    %96 = vector.load %arg6[%c16_84, %c0_85] : memref<36x288xbf16, #tpu.memory_space<vmem>>, vector<4x288xbf16>
    tpu.vector_store %arg6[%c16_84, %c0_85], %95 {strides = array<i32>} : memref<36x288xbf16, #tpu.memory_space<vmem>>, vector<4x288xbf16>,
    %c0_86 = arith.constant 0 : index
    %c0_87 = arith.constant 0 : index
    %c20 = arith.constant 20 : index
    %97 = vector.load %arg5[%c0_86, %c0_87, %c20] : memref<1x4x326xbf16, #tpu.memory_space<vmem>>, vector<1x4x288xbf16>
    %98 = vector.shape_cast %97 : vector<1x4x288xbf16> to vector<4x288xbf16>
    %c20_88 = arith.constant 20 : index
    %c0_89 = arith.constant 0 : index
    %99 = vector.load %arg6[%c20_88, %c0_89] : memref<36x288xbf16, #tpu.memory_space<vmem>>, vector<4x288xbf16>
    tpu.vector_store %arg6[%c20_88, %c0_89], %98 {strides = array<i32>} : memref<36x288xbf16, #tpu.memory_space<vmem>>, vector<4x288xbf16>,
    %c0_90 = arith.constant 0 : index
    %c0_91 = arith.constant 0 : index
    %c36 = arith.constant 36 : index
    %100 = vector.load %arg5[%c0_90, %c0_91, %c36] : memref<1x4x326xbf16, #tpu.memory_space<vmem>>, vector<1x4x288xbf16>
    %101 = vector.shape_cast %100 : vector<1x4x288xbf16> to vector<4x288xbf16>
    %c24 = arith.constant 24 : index
    %c0_92 = arith.constant 0 : index
    %102 = vector.load %arg6[%c24, %c0_92] : memref<36x288xbf16, #tpu.memory_space<vmem>>, vector<4x288xbf16>
    tpu.vector_store %arg6[%c24, %c0_92], %101 {strides = array<i32>} : memref<36x288xbf16, #tpu.memory_space<vmem>>, vector<4x288xbf16>,
    %c0_93 = arith.constant 0 : index
    %c0_94 = arith.constant 0 : index
    %c37_95 = arith.constant 37 : index
    %103 = vector.load %arg5[%c0_93, %c0_94, %c37_95] : memref<1x4x326xbf16, #tpu.memory_space<vmem>>, vector<1x4x288xbf16>
    %104 = vector.shape_cast %103 : vector<1x4x288xbf16> to vector<4x288xbf16>
    %c28 = arith.constant 28 : index
    %c0_96 = arith.constant 0 : index
    %105 = vector.load %arg6[%c28, %c0_96] : memref<36x288xbf16, #tpu.memory_space<vmem>>, vector<4x288xbf16>
    tpu.vector_store %arg6[%c28, %c0_96], %104 {strides = array<i32>} : memref<36x288xbf16, #tpu.memory_space<vmem>>, vector<4x288xbf16>,
    %c0_97 = arith.constant 0 : index
    %c0_98 = arith.constant 0 : index
    %c38 = arith.constant 38 : index
    %106 = vector.load %arg5[%c0_97, %c0_98, %c38] : memref<1x4x326xbf16, #tpu.memory_space<vmem>>, vector<1x4x288xbf16>
    %107 = vector.shape_cast %106 : vector<1x4x288xbf16> to vector<4x288xbf16>
    %c32_99 = arith.constant 32 : index
    %c0_100 = arith.constant 0 : index
    %108 = vector.load %arg6[%c32_99, %c0_100] : memref<36x288xbf16, #tpu.memory_space<vmem>>, vector<4x288xbf16>
    tpu.vector_store %arg6[%c32_99, %c0_100], %107 {strides = array<i32>} : memref<36x288xbf16, #tpu.memory_space<vmem>>, vector<4x288xbf16>,
    %c0_101 = arith.constant 0 : index
    %c0_102 = arith.constant 0 : index
    %109 = vector.load %arg2[%c0_101, %c0_102] : memref<8x36xbf16, #tpu.memory_space<vmem>>, vector<8x36xbf16>
    %c0_103 = arith.constant 0 : index
    %c0_104 = arith.constant 0 : index
    %110 = vector.load %arg6[%c0_103, %c0_104] : memref<36x288xbf16, #tpu.memory_space<vmem>>, vector<36x288xbf16>
    %cst_105 = arith.constant dense<0.000000e+00> : vector<8x288xf32>
    %111 = tpu.matmul %109, %110, %cst_105 {dimension_numbers = #tpu.dot_dimension_numbers<[1], [0], [0], [1], [0, 0, 1, 1], [], []>} : vector<8x36xbf16>, vector<36x288xbf16>, vector<8x288xf32> -> vector<8x288xf32>
    %c0_106 = arith.constant 0 : index
    %c0_107 = arith.constant 0 : index
    %112 = vector.load %arg3[%c0_106, %c0_107] : memref<8x1xf32, #tpu.memory_space<vmem>>, vector<8x1xf32>
    %113 = vector.broadcast %112 : vector<8x1xf32> to vector<8x288xf32>
    %114 = arith.addf %111, %113 : vector<8x288xf32>
    %115 = vector.extract_strided_slice %114 {offsets = [0, 0], sizes = [8, 16], strides = [1, 1]} : vector<8x288xf32> to vector<8x16xf32>
    %c0_108 = arith.constant 0 : index
    %c0_109 = arith.constant 0 : index
    %c0_110 = arith.constant 0 : index
    %116 = vector.load %arg4[%c0_108, %c0_109, %c0_110] : memref<1x8x256xf32, #tpu.memory_space<vmem>>, vector<1x8x16xf32>
    %117 = vector.shape_cast %116 : vector<1x8x16xf32> to vector<8x16xf32>
    %118 = vector.shape_cast %115 : vector<8x16xf32> to vector<1x8x16xf32>
    tpu.vector_store %arg4[%c0_108, %c0_109, %c0_110], %118 {strides = array<i32>} : memref<1x8x256xf32, #tpu.memory_space<vmem>>, vector<1x8x16xf32>,
    %119 = vector.extract_strided_slice %114 {offsets = [0, 18], sizes = [8, 16], strides = [1, 1]} : vector<8x288xf32> to vector<8x16xf32>
    %c0_111 = arith.constant 0 : index
    %c0_112 = arith.constant 0 : index
    %c16_113 = arith.constant 16 : index
    %120 = vector.load %arg4[%c0_111, %c0_112, %c16_113] : memref<1x8x256xf32, #tpu.memory_space<vmem>>, vector<1x8x16xf32>
    %121 = vector.shape_cast %120 : vector<1x8x16xf32> to vector<8x16xf32>
    %122 = vector.shape_cast %119 : vector<8x16xf32> to vector<1x8x16xf32>
    tpu.vector_store %arg4[%c0_111, %c0_112, %c16_113], %122 {strides = array<i32>} : memref<1x8x256xf32, #tpu.memory_space<vmem>>, vector<1x8x16xf32>,
    %123 = vector.extract_strided_slice %114 {offsets = [0, 36], sizes = [8, 16], strides = [1, 1]} : vector<8x288xf32> to vector<8x16xf32>
    %c0_114 = arith.constant 0 : index
    %c0_115 = arith.constant 0 : index
    %c32_116 = arith.constant 32 : index
    %124 = vector.load %arg4[%c0_114, %c0_115, %c32_116] : memref<1x8x256xf32, #tpu.memory_space<vmem>>, vector<1x8x16xf32>
    %125 = vector.shape_cast %124 : vector<1x8x16xf32> to vector<8x16xf32>
    %126 = vector.shape_cast %123 : vector<8x16xf32> to vector<1x8x16xf32>
    tpu.vector_store %arg4[%c0_114, %c0_115, %c32_116], %126 {strides = array<i32>} : memref<1x8x256xf32, #tpu.memory_space<vmem>>, vector<1x8x16xf32>,
    %127 = vector.extract_strided_slice %114 {offsets = [0, 54], sizes = [8, 16], strides = [1, 1]} : vector<8x288xf32> to vector<8x16xf32>
    %c0_117 = arith.constant 0 : index
    %c0_118 = arith.constant 0 : index
    %c48_119 = arith.constant 48 : index
    %128 = vector.load %arg4[%c0_117, %c0_118, %c48_119] : memref<1x8x256xf32, #tpu.memory_space<vmem>>, vector<1x8x16xf32>
    %129 = vector.shape_cast %128 : vector<1x8x16xf32> to vector<8x16xf32>
    %130 = vector.shape_cast %127 : vector<8x16xf32> to vector<1x8x16xf32>
    tpu.vector_store %arg4[%c0_117, %c0_118, %c48_119], %130 {strides = array<i32>} : memref<1x8x256xf32, #tpu.memory_space<vmem>>, vector<1x8x16xf32>,
    %131 = vector.extract_strided_slice %114 {offsets = [0, 72], sizes = [8, 16], strides = [1, 1]} : vector<8x288xf32> to vector<8x16xf32>
    %c0_120 = arith.constant 0 : index
    %c0_121 = arith.constant 0 : index
    %c64_122 = arith.constant 64 : index
    %132 = vector.load %arg4[%c0_120, %c0_121, %c64_122] : memref<1x8x256xf32, #tpu.memory_space<vmem>>, vector<1x8x16xf32>
    %133 = vector.shape_cast %132 : vector<1x8x16xf32> to vector<8x16xf32>
    %134 = vector.shape_cast %131 : vector<8x16xf32> to vector<1x8x16xf32>
    tpu.vector_store %arg4[%c0_120, %c0_121, %c64_122], %134 {strides = array<i32>} : memref<1x8x256xf32, #tpu.memory_space<vmem>>, vector<1x8x16xf32>,
    %135 = vector.extract_strided_slice %114 {offsets = [0, 90], sizes = [8, 16], strides = [1, 1]} : vector<8x288xf32> to vector<8x16xf32>
    %c0_123 = arith.constant 0 : index
    %c0_124 = arith.constant 0 : index
    %c80_125 = arith.constant 80 : index
    %136 = vector.load %arg4[%c0_123, %c0_124, %c80_125] : memref<1x8x256xf32, #tpu.memory_space<vmem>>, vector<1x8x16xf32>
    %137 = vector.shape_cast %136 : vector<1x8x16xf32> to vector<8x16xf32>
    %138 = vector.shape_cast %135 : vector<8x16xf32> to vector<1x8x16xf32>
    tpu.vector_store %arg4[%c0_123, %c0_124, %c80_125], %138 {strides = array<i32>} : memref<1x8x256xf32, #tpu.memory_space<vmem>>, vector<1x8x16xf32>,
    %139 = vector.extract_strided_slice %114 {offsets = [0, 108], sizes = [8, 16], strides = [1, 1]} : vector<8x288xf32> to vector<8x16xf32>
    %c0_126 = arith.constant 0 : index
    %c0_127 = arith.constant 0 : index
    %c96_128 = arith.constant 96 : index
    %140 = vector.load %arg4[%c0_126, %c0_127, %c96_128] : memref<1x8x256xf32, #tpu.memory_space<vmem>>, vector<1x8x16xf32>
    %141 = vector.shape_cast %140 : vector<1x8x16xf32> to vector<8x16xf32>
    %142 = vector.shape_cast %139 : vector<8x16xf32> to vector<1x8x16xf32>
    tpu.vector_store %arg4[%c0_126, %c0_127, %c96_128], %142 {strides = array<i32>} : memref<1x8x256xf32, #tpu.memory_space<vmem>>, vector<1x8x16xf32>,
    %143 = vector.extract_strided_slice %114 {offsets = [0, 126], sizes = [8, 16], strides = [1, 1]} : vector<8x288xf32> to vector<8x16xf32>
    %c0_129 = arith.constant 0 : index
    %c0_130 = arith.constant 0 : index
    %c112_131 = arith.constant 112 : index
    %144 = vector.load %arg4[%c0_129, %c0_130, %c112_131] : memref<1x8x256xf32, #tpu.memory_space<vmem>>, vector<1x8x16xf32>
    %145 = vector.shape_cast %144 : vector<1x8x16xf32> to vector<8x16xf32>
    %146 = vector.shape_cast %143 : vector<8x16xf32> to vector<1x8x16xf32>
    tpu.vector_store %arg4[%c0_129, %c0_130, %c112_131], %146 {strides = array<i32>} : memref<1x8x256xf32, #tpu.memory_space<vmem>>, vector<1x8x16xf32>,
    %147 = vector.extract_strided_slice %114 {offsets = [0, 144], sizes = [8, 16], strides = [1, 1]} : vector<8x288xf32> to vector<8x16xf32>
    %c0_132 = arith.constant 0 : index
    %c0_133 = arith.constant 0 : index
    %c128_134 = arith.constant 128 : index
    %148 = vector.load %arg4[%c0_132, %c0_133, %c128_134] : memref<1x8x256xf32, #tpu.memory_space<vmem>>, vector<1x8x16xf32>
    %149 = vector.shape_cast %148 : vector<1x8x16xf32> to vector<8x16xf32>
    %150 = vector.shape_cast %147 : vector<8x16xf32> to vector<1x8x16xf32>
    tpu.vector_store %arg4[%c0_132, %c0_133, %c128_134], %150 {strides = array<i32>} : memref<1x8x256xf32, #tpu.memory_space<vmem>>, vector<1x8x16xf32>,
    %151 = vector.extract_strided_slice %114 {offsets = [0, 162], sizes = [8, 16], strides = [1, 1]} : vector<8x288xf32> to vector<8x16xf32>
    %c0_135 = arith.constant 0 : index
    %c0_136 = arith.constant 0 : index
    %c144_137 = arith.constant 144 : index
    %152 = vector.load %arg4[%c0_135, %c0_136, %c144_137] : memref<1x8x256xf32, #tpu.memory_space<vmem>>, vector<1x8x16xf32>
    %153 = vector.shape_cast %152 : vector<1x8x16xf32> to vector<8x16xf32>
    %154 = vector.shape_cast %151 : vector<8x16xf32> to vector<1x8x16xf32>
    tpu.vector_store %arg4[%c0_135, %c0_136, %c144_137], %154 {strides = array<i32>} : memref<1x8x256xf32, #tpu.memory_space<vmem>>, vector<1x8x16xf32>,
    %155 = vector.extract_strided_slice %114 {offsets = [0, 180], sizes = [8, 16], strides = [1, 1]} : vector<8x288xf32> to vector<8x16xf32>
    %c0_138 = arith.constant 0 : index
    %c0_139 = arith.constant 0 : index
    %c160_140 = arith.constant 160 : index
    %156 = vector.load %arg4[%c0_138, %c0_139, %c160_140] : memref<1x8x256xf32, #tpu.memory_space<vmem>>, vector<1x8x16xf32>
    %157 = vector.shape_cast %156 : vector<1x8x16xf32> to vector<8x16xf32>
    %158 = vector.shape_cast %155 : vector<8x16xf32> to vector<1x8x16xf32>
    tpu.vector_store %arg4[%c0_138, %c0_139, %c160_140], %158 {strides = array<i32>} : memref<1x8x256xf32, #tpu.memory_space<vmem>>, vector<1x8x16xf32>,
    %159 = vector.extract_strided_slice %114 {offsets = [0, 198], sizes = [8, 16], strides = [1, 1]} : vector<8x288xf32> to vector<8x16xf32>
    %c0_141 = arith.constant 0 : index
    %c0_142 = arith.constant 0 : index
    %c176_143 = arith.constant 176 : index
    %160 = vector.load %arg4[%c0_141, %c0_142, %c176_143] : memref<1x8x256xf32, #tpu.memory_space<vmem>>, vector<1x8x16xf32>
    %161 = vector.shape_cast %160 : vector<1x8x16xf32> to vector<8x16xf32>
    %162 = vector.shape_cast %159 : vector<8x16xf32> to vector<1x8x16xf32>
    tpu.vector_store %arg4[%c0_141, %c0_142, %c176_143], %162 {strides = array<i32>} : memref<1x8x256xf32, #tpu.memory_space<vmem>>, vector<1x8x16xf32>,
    %163 = vector.extract_strided_slice %114 {offsets = [0, 216], sizes = [8, 16], strides = [1, 1]} : vector<8x288xf32> to vector<8x16xf32>
    %c0_144 = arith.constant 0 : index
    %c0_145 = arith.constant 0 : index
    %c192_146 = arith.constant 192 : index
    %164 = vector.load %arg4[%c0_144, %c0_145, %c192_146] : memref<1x8x256xf32, #tpu.memory_space<vmem>>, vector<1x8x16xf32>
    %165 = vector.shape_cast %164 : vector<1x8x16xf32> to vector<8x16xf32>
    %166 = vector.shape_cast %163 : vector<8x16xf32> to vector<1x8x16xf32>
    tpu.vector_store %arg4[%c0_144, %c0_145, %c192_146], %166 {strides = array<i32>} : memref<1x8x256xf32, #tpu.memory_space<vmem>>, vector<1x8x16xf32>,
    %167 = vector.extract_strided_slice %114 {offsets = [0, 234], sizes = [8, 16], strides = [1, 1]} : vector<8x288xf32> to vector<8x16xf32>
    %c0_147 = arith.constant 0 : index
    %c0_148 = arith.constant 0 : index
    %c208_149 = arith.constant 208 : index
    %168 = vector.load %arg4[%c0_147, %c0_148, %c208_149] : memref<1x8x256xf32, #tpu.memory_space<vmem>>, vector<1x8x16xf32>
    %169 = vector.shape_cast %168 : vector<1x8x16xf32> to vector<8x16xf32>
    %170 = vector.shape_cast %167 : vector<8x16xf32> to vector<1x8x16xf32>
    tpu.vector_store %arg4[%c0_147, %c0_148, %c208_149], %170 {strides = array<i32>} : memref<1x8x256xf32, #tpu.memory_space<vmem>>, vector<1x8x16xf32>,
    %171 = vector.extract_strided_slice %114 {offsets = [0, 252], sizes = [8, 16], strides = [1, 1]} : vector<8x288xf32> to vector<8x16xf32>
    %c0_150 = arith.constant 0 : index
    %c0_151 = arith.constant 0 : index
    %c224_152 = arith.constant 224 : index
    %172 = vector.load %arg4[%c0_150, %c0_151, %c224_152] : memref<1x8x256xf32, #tpu.memory_space<vmem>>, vector<1x8x16xf32>
    %173 = vector.shape_cast %172 : vector<1x8x16xf32> to vector<8x16xf32>
    %174 = vector.shape_cast %171 : vector<8x16xf32> to vector<1x8x16xf32>
    tpu.vector_store %arg4[%c0_150, %c0_151, %c224_152], %174 {strides = array<i32>} : memref<1x8x256xf32, #tpu.memory_space<vmem>>, vector<1x8x16xf32>,
    %175 = vector.extract_strided_slice %114 {offsets = [0, 270], sizes = [8, 16], strides = [1, 1]} : vector<8x288xf32> to vector<8x16xf32>
    %c0_153 = arith.constant 0 : index
    %c0_154 = arith.constant 0 : index
    %c240_155 = arith.constant 240 : index
    %176 = vector.load %arg4[%c0_153, %c0_154, %c240_155] : memref<1x8x256xf32, #tpu.memory_space<vmem>>, vector<1x8x16xf32>
    %177 = vector.shape_cast %176 : vector<1x8x16xf32> to vector<8x16xf32>
    %178 = vector.shape_cast %175 : vector<8x16xf32> to vector<1x8x16xf32>
    tpu.vector_store %arg4[%c0_153, %c0_154, %c240_155], %178 {strides = array<i32>} : memref<1x8x256xf32, #tpu.memory_space<vmem>>, vector<1x8x16xf32>,
    return
  }
  func.func @transform_0(%arg0: i32) -> (i32, i32, i32) {
    %c0_i32 = arith.constant 0 : i32
    %c0_i32_0 = arith.constant 0 : i32
    %c0_i32_1 = arith.constant 0 : i32
    return %arg0, %c0_i32, %c0_i32_0 : i32, i32, i32
  }
  func.func @transform_1(%arg0: i32) -> (i32, i32) {
    %c0_i32 = arith.constant 0 : i32
    %c0_i32_0 = arith.constant 0 : i32
    %c0_i32_1 = arith.constant 0 : i32
    return %c0_i32, %c0_i32_0 : i32, i32
  }
  func.func @transform_2(%arg0: i32) -> (i32, i32) {
    %c0_i32 = arith.constant 0 : i32
    %c0_i32_0 = arith.constant 0 : i32
    %c0_i32_1 = arith.constant 0 : i32
    return %c0_i32, %c0_i32_0 : i32, i32
  }
  func.func @transform_3(%arg0: i32) -> (i32, i32, i32) {
    %c0_i32 = arith.constant 0 : i32
    %c0_i32_0 = arith.constant 0 : i32
    %c0_i32_1 = arith.constant 0 : i32
    return %arg0, %c0_i32, %c0_i32_0 : i32, i32, i32
  }
}

</mosaic_0001>

<bundles_post_ra>
// kernel: tpu_custom_call.1
= control target key start
LH: loop header
LB: loop body
LE: loop exit
PB: predicated region body
PF: predicated region fallthrough
CT: control target
= control target key end

     0   :  { %8 = vsyncpa [#allocation5], 0  ;;  %s1225_s0 = inlined_call_operand.vmem [shape: bf16[2,4,256], index: 0, kind: input, shape index: {}]   ;;  %s1226_s1 = inlined_call_operand.hbm [shape: bf16[8,36], index: 1, kind: input, shape index: {}]   ;;  %s1227_s2 = inlined_call_operand.vmem [shape: f32[8,1], index: 2, kind: input, shape index: {}]   ;;  %s1228_s3 = inlined_call_operand.hbm [shape: f32[2,8,256], index: 3, kind: output, shape index: {}]  }
   0x1   :  { %9 = vsyncpa [#allocation6], 0 }
   0x2   :  { %11 = vsyncpa [#allocation6 + $0x1], 0  ;;  %s1060_s12 = smov 0   ;;  %s1062_s13 = smov 0  }
   0x3   :  { %s1064_s14 = smov 0   ;;  %s1066_s15 = smov 0  }
   0x4 LB: > { %s1081_s16 = sadd.s32 4294967295, %s1000_s15   ;;  %s766_s17 = sadd.s32 4294967294, %s1000_s15   ;;  %s1000_s15 = sphi %s1066_s15, %s1234_s15   ;;  %s996_s14 = sphi %s1064_s14, %s1233_s14   ;;  %s992_s13 = sphi %s1062_s13, %s1232_s13   ;;  %s988_s12 = sphi %s1060_s12, %s1231_s12  }
   0x5   : > { %s1085_s18 = sadd.s32 1, %s1000_s15   ;;  %s92_s19 = sadd.s32 1, %s996_s14 }
   0x6   : > { %s89_s20 = ssub.s32 %s1000_s15, %s1085_s18  ;;  %p102_p0 = scmp.ne.s32.totalorder %s996_s14, %s992_s13 }
   0x7   : > { %p90_p1 = scmp.eq.s32.totalorder %s89_s20, 0  ;;  %p103_p2 = scmp.eq.s32.totalorder %s1081_s16, 1 }
   0x8   : > { %p108_p3 = scmp.ne.s32.totalorder %s992_s13, %s988_s12  ;;  %p109_p4 = scmp.eq.s32.totalorder %s766_s17, 1 }
   0x9   : > { %s1096_s21 = scalar_select %p90_p1, %s996_s14, %s92_s19  }
   0xa   : > { %p1098_p5 = por %p103_p2, %p102_p0  ;;  %p1102_p6 = por %p109_p4, %p108_p3 }
   0xb   : > { %p767_p7 = scmp.ge.s32.totalorder %s1000_s15, 1  ;;  %p116_p8 = scmp.lt.s32.totalorder %s1000_s15, 3 }
   0xc   : > { %p829_p9 = scmp.eq.s32.totalorder %s1081_s16, 0  ;;  %s128_s26 = sshll.u32 %s1226_s1, 4  ;;  %s129_s26 = int_to_ptr.hbm [resolvable:$true] %s128_s26 }
   0xd   : > { %p117_p10 = pnand %p767_p7, %p116_p8  ;;  %s1002_s27 = smov [#allocation4]  }
   0xe   : > { %s130_s28 = sshll.u32 %s1002_s27, 4  ;;  %s131_s28 = int_to_ptr.vmem [resolvable:$true] %s130_s28 }
   0xf   : > { %p821_p11 = pneg %p117_p10  ;;  %154 = sbr.rel (%p117_p10) target bundleno = 699 (0x2bb), region = 32 }
  0x11   : > { %p822_p12 = pnand %p829_p9, %p821_p11 }
  0x13   : > { %824 = dma.hbm_to_vmem [thread:$0]  (!%p822_p12), %s129_s26, 64, %s131_s28, [#allocation5]  }
  0x14   : > { %979 = dma.done.wait (%p829_p9), [#allocation5], 64  }
  0x15   : > { %981 = vsyncadd (%p829_p9), [#allocation5], 4294967232  ;;  %p179_p13 = scmp.lt.s32.totalorder %s1081_s16, 1  ;;  %s1003_s7 = smov 19   ;;  %vm185_vm0 = vcmask 1041408   ;;  %vm186_vm1 = vcmask 1043458  }
  0x16   : > { %s1004_s8 = smov 23   ;;  %s1005_s9 = smov 31   ;;  %vm187_vm2 = vmor %vm186_vm1, %vm185_vm0  ;;  %vm188_vm3 = vcmask 570372   ;;  %v1008_v6 = vmov 0   ;;  %vm196_vm5 = vcmask 279704   ;;  %vm203_vm6 = vcmask 427304  }
  0x17   : > { %s180_s29 = scalar_select %p179_p13, %s1081_s16, 1  ;;  %vm189_vm4 = vmor %vm188_vm3, %vm187_vm2  ;;  %902 = vset.pattern.permute.xlu2 %v1008_v6  ;;  %903 = vset.pattern.permute.xlu0 %v1008_v6  ;;  %vm210_vm7 = vcmask 574904   ;;  %vm217_vm8 = vcmask 722504   ;;  %vm224_vm9 = vcmask 870104   ;;  %vm241_vm10 = vcmask 1042424  }
  0x18   : > { %s1006_s10 = smov 21   ;;  %s1007_s11 = smov 25   ;;  %190 = vst.msk [vmem:[#allocation2] sm:$0x3f] %vm189_vm4, %v1008_v6  ;;  %vm242_vm11 = vcmask 117762   ;;  %vm238_vm12 = vcmask 252928  }
  0x19   : > { %s807_s30 = sshll.u32 %s180_s29, 2  ;;  %s1009_s17 = smov 27   ;;  %vm231_vm13 = vcmask 1017704   ;;  %vm243_vm14 = vmor %vm242_vm11, %vm241_vm10  ;;  %vm250_vm15 = vcmask 263304   ;;  %vm257_vm1 = vcmask 410904   ;;  %vm264_vm2 = vcmask 558504  }
  0x1a   : > { %s1117_s6 = scalar_lea.vmem %s1225_s0, %s807_s30  ;;  %s1010_s19 = smov 29   ;;  %vm271_vm3 = vcmask 706104   ;;  %vm295_vm4 = vcmask 1042408   ;;  %vm304_vm10 = vcmask 246904   ;;  %vm311_vm11 = vcmask 394504  }
  0x1b   : > { %v191_v0 = vld [vmem:[%s1117_s6] sm:$0x3]  ;;  %s1011_s20 = smov 33   ;;  %v252_v9 = vld [vmem:[%s1117_s6 + $0x2] sm:$0x3]  ;;  %s1012_s24 = smov 35  }
  0x1c   : > { %v205_v1 = vld [vmem:[%s1117_s6] sm:$0x3]  ;;  %193 = vrot.lane.b32.xlu0 %v191_v0, %s1003_s7  ;;  %v259_v10 = vld [vmem:[%s1117_s6 + $0x2] sm:$0x3]  ;;  %s1013_s25 = smov 37   ;;  %s1014_s26 = smov 39  }
  0x1d   : > { %207 = vrot.lane.b32.xlu1 %v205_v1, %s1004_s8  ;;  %v233_v2 = vld [vmem:[%s1117_s6] sm:$0x3]  ;;  %v266_v11 = vld [vmem:[%s1117_s6 + $0x2] sm:$0x3]  ;;  %s1015_s27 = smov 45   ;;  %s1016_s28 = smov 41  }
  0x1e   : > { %235 = vrot.lane.b32.xlu2 %v233_v2, %s1005_s9  ;;  %v198_v3 = vld [vmem:[%s1117_s6] sm:$0x3]  ;;  %v287_v12 = vld [vmem:[%s1117_s6 + $0x2] sm:$0x3]  ;;  %s1017_s29 = smov 43   ;;  %s1018_s30 = smov 47  }
  0x1f   : > { %v212_v4 = vld [vmem:[%s1117_s6] sm:$0x3]  ;;  %v273_v13 = vld [vmem:[%s1117_s6 + $0x2] sm:$0x3]  ;;  %s1019_s4 = smov 49   ;;  %s1020_s5 = smov 109  }
  0x20   : > { %v219_v5 = vld [vmem:[%s1117_s6] sm:$0x3]  ;;  %v280_v14 = vld [vmem:[%s1117_s6 + $0x2] sm:$0x3]  ;;  %s1022_s7 = smov 92   ;;  %s1023_s8 = smov 91  }
  0x21   : > { %v226_v7 = vld [vmem:[%s1117_s6] sm:$0x3]  ;;  %v299_v15 = vld [vmem:[%s1117_s6 + $0x2] sm:$0x3]  ;;  %s1024_s9 = smov 127  }
  0x22   : > { %v245_v8 = vld [vmem:[%s1117_s6] sm:$0x3]  ;;  %v306_v16 = vld [vmem:[%s1117_s6 + $0x2] sm:$0x3]  ;;  %s1021_s6 = smov 108  }
  0x24   : > { %200 = vrot.lane.b32.xlu0 %v198_v3, %s1006_s10  ;;  %s1025_s10 = smov 90  }
  0x25   : > { %214 = vrot.lane.b32.xlu1 %v212_v4, %s1007_s11  ;;  %s1026_s11 = smov 110  }
  0x26   : > { %221 = vrot.lane.b32.xlu2 %v219_v5, %s1009_s17  ;;  %s1027_s17 = smov 126  }
  0x2c   : > { %228 = vrot.lane.b32.xlu0 %v226_v7, %s1010_s19 }
  0x2d   : > { %247 = vrot.lane.b32.xlu1 %v245_v8, %s1011_s20 }
  0x2e   : > { %254 = vrot.lane.b32.xlu2 %v252_v9, %s1012_s24  ;;  %s176_s24 = sand.u32 1, %s992_s13  }
  0x34   : > { %261 = vrot.lane.b32.xlu0 %v259_v10, %s1013_s25  ;;  %s772_s25 = sshll.u32 %s176_s24, 4 }
  0x35   : > { %268 = vrot.lane.b32.xlu1 %v266_v11, %s1014_s26  ;;  %s1028_s26 = smov 124  }
  0x36   : > { %289 = vrot.lane.b32.xlu2 %v287_v12, %s1015_s27  ;;  %s1169_s27 = scalar_lea.vmem [#allocation7], %s772_s25 }
  0x3c   : > { %275 = vrot.lane.b32.xlu0 %v273_v13, %s1016_s28  ;;  %s1029_s28 = smov 112  }
  0x3d   : > { %282 = vrot.lane.b32.xlu1 %v280_v14, %s1017_s29  ;;  %s1030_s29 = smov 122  }
  0x3e   : > { %301 = vrot.lane.b32.xlu2 %v299_v15, %s1018_s30  ;;  %s1031_s30 = smov 120  }
  0x44   : > { %308 = vrot.lane.b32.xlu0 %v306_v16, %s1019_s4  ;;  %s1032_s4 = smov 106  }
  0x78   : > { %v236_v17 = vpop.permute.xlu2 %235 }
  0x79   : > { %v237_v23 = vrot.slane %v236_v17, 6 }
  0x7b   : > { %v239_v27 = vsel %vm238_vm12, %v237_v23, %v236_v17  ;;  %vm321_vm12 = vcmask 254976  }
  0x80   : > { %v222_v20 = vpop.permute.xlu2 %221 }
  0x88   : > { %v255_v24 = vpop.permute.xlu2 %254 }
  0x8e   : > { %v194_v18 = vpop.permute.xlu0 %193 }
  0x8f   : > { %v208_v19 = vpop.permute.xlu1 %207  ;;  %197 = vst.msk [vmem:[#allocation2] sm:$0x3] %vm196_vm5, %v194_v18  ;;  %vm296_vm5 = vcmask 101378  }
  0x90   : > { %v290_v30 = vpop.permute.xlu2 %289 }
  0x91   : > { %v291_v31 = vrot.slane %v290_v30, 6 }
  0x96   : > { %v201_v21 = vpop.permute.xlu0 %200 }
  0x97   : > { %v215_v22 = vpop.permute.xlu1 %214  ;;  %204 = vst.msk [vmem:[#allocation2] sm:$0x3] %vm203_vm6, %v201_v21  ;;  %vm278_vm6 = vcmask 853704  }
  0x98   : > { %211 = vst.msk [vmem:[#allocation2] sm:$0x3] %vm210_vm7, %v208_v19  ;;  %vm292_vm7 = vcmask 367616   ;;  %v302_v34 = vpop.permute.xlu2 %301 }
  0x99   : > { %218 = vst.msk [vmem:[#allocation2] sm:$0x3] %vm217_vm8, %v215_v22  ;;  %vm285_vm8 = vcmask 1001304   ;;  %v293_v35 = vsel %vm292_vm7, %v291_v31, %v290_v30  ;;  %vm381_vm7 = vcmask 900096  }
  0x9a   : > { %225 = vst.msk [vmem:[#allocation2] sm:$0x3] %vm224_vm9, %v222_v20  ;;  %vm297_vm9 = vmor %vm296_vm5, %vm295_vm4  ;;  %vm339_vm4 = vcmask 1039360   ;;  %vm483_vm5 = vcmask 736256  }
  0x9e   : > { %v229_v25 = vpop.permute.xlu0 %228 }
  0x9f   : > { %v248_v26 = vpop.permute.xlu1 %247  ;;  %232 = vst.msk [vmem:[#allocation2] sm:$0x3] %vm231_vm13, %v229_v25  ;;  %vm337_vm13 = vcmask 1043456  }
  0xa0   : > { %244 = vst.msk [vmem:[#allocation2] sm:$0xf] %vm243_vm14, %v239_v27  ;;  %vm401_vm14 = vcmask 891904  }
  0xa1   : > { %251 = vst.msk [vmem:[#allocation2 + $0x2] sm:$0x3] %vm250_vm15, %v248_v26  ;;  %vm344_vm15 = vcmask 257026  }
  0xa2   : > { %258 = vst.msk [vmem:[#allocation2 + $0x2] sm:$0x3] %vm257_vm1, %v255_v24  ;;  %vm422_vm1 = vcmask 883712  }
  0xa6   : > { %v262_v28 = vpop.permute.xlu0 %261 }
  0xa7   : > { %v269_v29 = vpop.permute.xlu1 %268  ;;  %265 = vst.msk [vmem:[#allocation2 + $0x2] sm:$0x3] %vm264_vm2, %v262_v28  ;;  %vm442_vm2 = vcmask 752640  }
  0xa8   : > { %272 = vst.msk [vmem:[#allocation2 + $0x2] sm:$0x3] %vm271_vm3, %v269_v29  ;;  %vm463_vm3 = vcmask 744448  }
  0xae   : > { %v276_v32 = vpop.permute.xlu0 %275 }
  0xaf   : > { %v283_v33 = vpop.permute.xlu1 %282  ;;  %279 = vst.msk [vmem:[#allocation2 + $0x2] sm:$0x3] %vm278_vm6, %v276_v32  ;;  %vm360_vm6 = vcmask 1031168  }
  0xb0   : > { %286 = vst.msk [vmem:[#allocation2 + $0x2] sm:$0x3] %vm285_vm8, %v283_v33  ;;  %vm598_vm8 = vcmask 130048  }
  0xb1   : > { %298 = vst.msk [vmem:[#allocation2 + $0x2] sm:$0xf] %vm297_vm9, %v293_v35  ;;  %vm604_vm9 = vcmask 261248  }
  0xb2   : > { %305 = vst.msk [vmem:[#allocation2 + $0x4] sm:$0x3] %vm304_vm10, %v302_v34  ;;  %vm609_vm10 = vcmask 392448  }
  0xb6   : > { %v309_v36 = vpop.permute.xlu0 %308 }
  0xb7   : > { %312 = vst.msk [vmem:[#allocation2 + $0x4] sm:$0x3] %vm311_vm11, %v309_v36  ;;  %vm614_vm11 = vcmask 523648  }
  0xbe   : > { %v313_v37 = vld [vmem:[#allocation2] sm:$0x3f] }
  0xbf   : > { %315 = vst [vmem:[#allocation1] ss:$2 sm:$0xff] %v313_v37  ;;  %v323_v38 = vld [vmem:[#allocation2] sm:$0x3f] }
  0xc0   : > { %v346_v41 = vld [vmem:[#allocation2] sm:$0x3f] }
  0xc1   : > { %v366_v44 = vld [vmem:[#allocation2] sm:$0x3f] }
  0xc2   : > { %v387_v47 = vld [vmem:[#allocation2] sm:$0x3f] }
  0xc3   : > { %v407_v50 = vld [vmem:[#allocation2] sm:$0x3f] }
  0xc4   : > { %v428_v53 = vld [vmem:[#allocation2] sm:$0x3f] }
  0xc5   : > { %v448_v56 = vld [vmem:[#allocation2] sm:$0x3f] }
  0xc6   : > { %v316_v39 = vld.sshfl [vmem:[#allocation1] sm:$0xff pattern:$0x75643120]  ;;  %v317_v40 = vld.sshfl [vmem:[#allocation1 + $0x8] sm:$0xff pattern:$0x75643120] }
  0xc7   : > { %326 = vst [vmem:[#allocation1 + $0x1] ss:$2 sm:$0xff] %v323_v38  ;;  %v469_v59 = vld [vmem:[#allocation2] sm:$0x3f] }
  0xc8   : > { %320 = vst [vmem:[#allocation3] sm:$0x33] %v316_v39 }
  0xc9   : > { %322 = vst.msk [vmem:[#allocation3 + $0x8] sm:$0x3] %vm321_vm12, %v317_v40 }
  0xce   : > { %v327_v42 = vld.sshfl [vmem:[#allocation1] sm:$0xff pattern:$0x75643120]  ;;  %v329_v43 = vld.sshfl [vmem:[#allocation1 + $0x8] sm:$0xff pattern:$0x75643120] }
  0xcf   : > { %348 = vst [vmem:[#allocation1] ss:$2 sm:$0xff] %v346_v41  ;;  %v500_v41 = vld [vmem:[%s1227_s2] sm:$0xff] }
  0xd6   : > { %v349_v45 = vld.sshfl [vmem:[#allocation1] sm:$0xff pattern:$0x75643120]  ;;  %v351_v46 = vld.sshfl [vmem:[#allocation1 + $0x8] sm:$0xff pattern:$0x75643120] }
  0xd7   : > { %369 = vst [vmem:[#allocation1 + $0x1] ss:$2 sm:$0xff] %v366_v44 }
  0xde   : > { %v370_v48 = vld.sshfl [vmem:[#allocation1] sm:$0xff pattern:$0x75643120]  ;;  %v372_v49 = vld.sshfl [vmem:[#allocation1 + $0x8] sm:$0xff pattern:$0x75643120] }
  0xdf   : > { %389 = vst [vmem:[#allocation1] ss:$2 sm:$0xff] %v387_v47 }
  0xe6   : > { %v392_v51 = vld.sshfl [vmem:[#allocation1 + $0x8] sm:$0xff pattern:$0x75643120]  ;;  %v390_v52 = vld.sshfl [vmem:[#allocation1] sm:$0xff pattern:$0x75643120] }
  0xe7   : > { %396 = vrot.lane.b32.xlu1 %v392_v51, %s1020_s5  ;;  %394 = vrot.lane.b32.xlu0 %v390_v52, %s1020_s5  ;;  %410 = vst [vmem:[#allocation1 + $0x1] ss:$2 sm:$0xff] %v407_v50  ;;  %s1033_s5 = smov 104  }
  0xee   : > { %v413_v54 = vld.sshfl [vmem:[#allocation1 + $0x8] sm:$0xff pattern:$0x75643120]  ;;  %v411_v55 = vld.sshfl [vmem:[#allocation1] sm:$0xff pattern:$0x75643120] }
  0xef   : > { %417 = vrot.lane.b32.xlu0 %v413_v54, %s1021_s6  ;;  %415 = vrot.lane.b32.xlu2 %v411_v55, %s1021_s6  ;;  %430 = vst [vmem:[#allocation1] ss:$2 sm:$0xff] %v428_v53 }
  0xf6   : > { %v433_v57 = vld.sshfl [vmem:[#allocation1 + $0x8] sm:$0xff pattern:$0x75643120]  ;;  %v431_v58 = vld.sshfl [vmem:[#allocation1] sm:$0xff pattern:$0x75643120] }
  0xf7   : > { %437 = vrot.lane.b32.xlu2 %v433_v57, %s1022_s7  ;;  %435 = vrot.lane.b32.xlu1 %v431_v58, %s1022_s7  ;;  %451 = vst [vmem:[#allocation1 + $0x1] ss:$2 sm:$0xff] %v448_v56  ;;  %s1034_s7 = smov 102  }
  0xfe   : > { %v454_v60 = vld.sshfl [vmem:[#allocation1 + $0x8] sm:$0xff pattern:$0x75643120]  ;;  %v452_v61 = vld.sshfl [vmem:[#allocation1] sm:$0xff pattern:$0x75643120] }
  0xff   : > { %458 = vrot.lane.b32.xlu1 %v454_v60, %s1023_s8  ;;  %456 = vrot.lane.b32.xlu0 %v452_v61, %s1023_s8  ;;  %471 = vst [vmem:[#allocation1] ss:$2 sm:$0xff] %v469_v59  ;;  %s1035_s8 = smov 118  }
 0x106   : > { %v474_v62 = vld.sshfl [vmem:[#allocation1 + $0x8] sm:$0xff pattern:$0x75643120]  ;;  %v472_v63 = vld.sshfl [vmem:[#allocation1] sm:$0xff pattern:$0x75643120] }
 0x107   : > { %333 = vrot.lane.b32.xlu0 %v329_v43, %s1024_s9  ;;  %478 = vrot.lane.b32.xlu2 %v474_v62, %s1025_s10 }
 0x108   : > { %476 = vrot.lane.b32.xlu1 %v472_v63, %s1025_s10  ;;  %s1038_s10 = smov 114  }
 0x10f   : > { %374 = vrot.lane.b32.xlu0 %v370_v48, %s1026_s11  ;;  %331 = vrot.lane.b32.xlu2 %v327_v42, %s1024_s9  ;;  %s1036_s9 = smov 100  }
 0x110   : > { %353 = vrot.lane.b32.xlu1 %v349_v45, %s1027_s17 }
 0x117   : > { %355 = vrot.lane.b32.xlu2 %v351_v46, %s1027_s17 }
 0x118   : > { %376 = vrot.lane.b32.xlu1 %v372_v49, %s1026_s11 }
 0x11f   : > { %503 = vperm.xlu2 %902, %v500_v41  }
 0x149   : > { %v416_v0 = vpop.permute.xlu2 %415 }
 0x14a   : > { %v419_v10 = vrot.slane %v416_v0, 4 }
 0x151   : > { %v438_v1 = vpop.permute.xlu2 %437 }
 0x152   : > { %447 = vst.msk [vmem:[#allocation3 + $0x2c] sm:$0x3] %vm321_vm12, %v438_v1  ;;  %v440_v16 = vrot.slane %v438_v1, 4 }
 0x159   : > { %v397_v2 = vpop.permute.xlu1 %396  ;;  %v395_v3 = vpop.permute.xlu0 %394 }
 0x15a   : > { %v399_v4 = vrot.slane %v397_v2, 4  ;;  %406 = vst.msk [vmem:[#allocation3 + $0x20] sm:$0x3] %vm321_vm12, %v397_v2  ;;  %v398_v5 = vrot.slane %v395_v3, 4 }
 0x15c   : > { %v400_v6 = vsel %vm337_vm13, %v398_v5, %v399_v4 }
 0x15d   : > { %v402_v7 = vsel %vm401_vm14, %v395_v3, %v400_v6  ;;  %vm629_vm14 = vcmask 917248  }
 0x15e   : > { %405 = vst [vmem:[#allocation3 + $0x18] sm:$0x33] %v402_v7 }
 0x161   : > { %v418_v8 = vpop.permute.xlu0 %417  ;;  %v479_v9 = vpop.permute.xlu2 %478 }
 0x162   : > { %v420_v11 = vrot.slane %v418_v8, 4  ;;  %427 = vst.msk [vmem:[#allocation3 + $0x20] sm:$0xc] %vm344_vm15, %v418_v8  ;;  %v481_v38 = vrot.slane %v479_v9, 4  ;;  %v489_v8 = vld [vmem:[#allocation4] sm:$0xf] }
 0x163   : > { %488 = vst.msk [vmem:[#allocation3 + $0x38] sm:$0x3] %vm321_vm12, %v479_v9 }
 0x164   : > { %v421_v12 = vsel %vm337_vm13, %v419_v10, %v420_v11 }
 0x165   : > { %v423_v13 = vsel %vm422_vm1, %v416_v0, %v421_v12  ;;  %vm639_vm1 = vcmask 1048448  }
 0x166   : > { %426 = vst [vmem:[#allocation3 + $0x18] sm:$0xcc] %v423_v13 }
 0x169   : > { %v436_v14 = vpop.permute.xlu1 %435  ;;  %v332_v15 = vpop.permute.xlu2 %331  ;;  %v797_v32 = vld [vmem:[#allocation3 + $0x20] sm:$0xf] }
 0x16a   : > { %v439_v17 = vrot.slane %v436_v14, 4  ;;  %v499_v18 = vld [vmem:[#allocation3 + $0x38] sm:$0x3]  ;;  %v335_v34 = vrot.slane %v332_v15, 4 }
 0x16b   : > { %v530_v19 = vunpack.c.l.b16 %v499_v18 }
 0x16c   : > { %v441_v20 = vsel %vm337_vm13, %v439_v17, %v440_v16 }
 0x16d   : > { %v443_v21 = vsel %vm442_vm2, %v436_v14, %v441_v20  ;;  %v539_v22 = vpack.c.b16 %v530_v19, %v530_v19  ;;  %v789_v0 = vld [vmem:[#allocation3 + $0x18] sm:$0xf]  ;;  %v811_v1 = vld [vmem:[#allocation3 + $0x1c] sm:$0xf]  ;;  %vm636_vm2 = vcmask 932864  }
 0x16e   : > { %446 = vst [vmem:[#allocation3 + $0x24] sm:$0x33] %v443_v21 }
 0x16f   : > { %v557_v23 = vsel %vm185_vm0, %v539_v22, 0 }
 0x170   : > { %590 = vmatpush.bf16.msra.mxu2 %v557_v23 }
 0x171   : > { %v459_v24 = vpop.permute.xlu1 %458  ;;  %v457_v25 = vpop.permute.xlu0 %456 }
 0x172   : > { %v461_v26 = vrot.slane %v459_v24, 4  ;;  %468 = vst.msk [vmem:[#allocation3 + $0x2c] sm:$0xc] %vm344_vm15, %v459_v24  ;;  %v460_v27 = vrot.slane %v457_v25, 4  ;;  %v356_v28 = vpop.permute.xlu2 %355 }
 0x173   : > { %365 = vst.msk [vmem:[#allocation3 + $0x14] sm:$0x3] %vm321_vm12, %v356_v28  ;;  %v358_v46 = vrot.slane %v356_v28, 4  ;;  %vm619_vm12 = vcmask 654848  }
 0x174   : > { %v462_v29 = vsel %vm337_vm13, %v460_v27, %v461_v26 }
 0x175   : > { %v464_v30 = vsel %vm463_vm3, %v457_v25, %v462_v29 }
 0x176   : > { %467 = vst [vmem:[#allocation3 + $0x24] sm:$0xcc] %v464_v30 }
 0x179   : > { %v334_v31 = vpop.permute.xlu0 %333  ;;  %v813_v33 = vld [vmem:[#allocation3 + $0x28] sm:$0xf0] }
 0x17a   : > { %v336_v35 = vrot.slane %v334_v31, 4  ;;  %345 = vst.msk [vmem:[#allocation3 + $0x8] sm:$0xc] %vm344_vm15, %v334_v31  ;;  %v477_v36 = vpop.permute.xlu1 %476  ;;  %v798_v37 = vor.u32 %v813_v33, %v797_v32 }
 0x17b   : > { %v480_v39 = vrot.slane %v477_v36, 4 }
 0x17c   : > { %v338_v40 = vsel %vm337_vm13, %v335_v34, %v336_v35  ;;  %591 = vmatpush.bf16.msra.mxu2 %v798_v37 }
 0x17d   : > { %v340_v42 = vsel %vm339_vm4, %v332_v15, %v338_v40  ;;  %v482_v43 = vsel %vm337_vm13, %v480_v39, %v481_v38  ;;  %v812_v57 = vld [vmem:[#allocation3 + $0x20] sm:$0xf0]  ;;  %v791_v58 = vld [vmem:[#allocation3 + $0x24] sm:$0xf0]  ;;  %v504_v15 = vpop.permute.xlu2 %503 }
 0x17e   : > { %343 = vst [vmem:[#allocation3] sm:$0xcc] %v340_v42  ;;  %v484_v44 = vsel %vm483_vm5, %v477_v36, %v482_v43  ;;  %v790_v3 = vor.u32 %v812_v57, %v789_v0  ;;  %v794_v4 = vor.u32 %v811_v1, %v791_v58 }
 0x17f   : > { %487 = vst [vmem:[#allocation3 + $0x30] sm:$0x33] %v484_v44 }
 0x181   : > { %v375_v53 = vpop.permute.xlu0 %374  ;;  %v785_v5 = vld [vmem:[#allocation3 + $0x8] sm:$0xf] }
 0x182   : > { %v354_v45 = vpop.permute.xlu1 %353  ;;  %v378_v59 = vrot.slane %v375_v53, 4 }
 0x183   : > { %v357_v47 = vrot.slane %v354_v45, 4 }
 0x185   : > { %v359_v48 = vsel %vm337_vm13, %v357_v47, %v358_v46  ;;  %v777_v9 = vld [vmem:[#allocation3] sm:$0xf]  ;;  %v808_v11 = vld [vmem:[#allocation3 + $0x4] sm:$0xf] }
 0x186   : > { %v361_v49 = vsel %vm360_vm6, %v354_v45, %v359_v48  ;;  %v498_v50 = vld [vmem:[#allocation3 + $0x30] sm:$0x33] }
 0x187   : > { %364 = vst [vmem:[#allocation3 + $0xc] sm:$0x33] %v361_v49  ;;  %v528_v51 = vunpack.c.l.b16 %v498_v50  ;;  %v529_v52 = vunpack.c.h.b16 %v498_v50 }
 0x189   : > { %v537_v54 = vpack.c.b16 %v528_v51, %v528_v51  ;;  %v538_v55 = vpack.c.b16 %v529_v52, %v529_v52 }
 0x18a   : > { %v377_v56 = vpop.permute.xlu1 %376 }
 0x18b   : > { %v379_v60 = vrot.slane %v377_v56, 4  ;;  %386 = vst.msk [vmem:[#allocation3 + $0x14] sm:$0xc] %vm344_vm15, %v377_v56  ;;  %v551_v61 = vsel %vm185_vm0, %v537_v54, 0  ;;  %v554_v62 = vsel %vm185_vm0, %v538_v55, 0  ;;  %vm546_vm0 = vcmask 293888  }
 0x18c   : > { %564 = vmatpush.bf16.msra.mxu0 %v551_v61  ;;  %577 = vmatpush.bf16.msra.mxu1 %v554_v62  ;;  %vm670_vm15 = vcmask 818176  }
 0x18d   : > { %v380_v63 = vsel %vm337_vm13, %v378_v59, %v379_v60  ;;  %vm624_vm13 = vcmask 786048  }
 0x18e   : > { %v382_v2 = vsel %vm381_vm7, %v375_v53, %v380_v63 }
 0x18f   : > { %385 = vst [vmem:[#allocation3 + $0xc] sm:$0xcc] %v382_v2 }
 0x190   : > { %565 = vmatpush.bf16.msra.mxu0 %v790_v3  ;;  %578 = vmatpush.bf16.msra.mxu1 %v794_v4 }
 0x192   : > { %v810_v6 = vld [vmem:[#allocation3 + $0x10] sm:$0xf0] }
 0x193   : > { %v786_v7 = vor.u32 %v810_v6, %v785_v5 }
 0x195   : > { %592 = vmatpush.bf16.msra.mxu2 %v786_v7 }
 0x196   : > { %v809_v10 = vld [vmem:[#allocation3 + $0x8] sm:$0xf0]  ;;  %v779_v12 = vld [vmem:[#allocation3 + $0xc] sm:$0xf0] }
 0x197   : > { %v778_v13 = vor.u32 %v809_v10, %v777_v9  ;;  %v782_v14 = vor.u32 %v808_v11, %v779_v12 }
 0x198   : > { %801 = vmatmul.msk.bf16.vlgmr.msra.gmra.mxu2 %vm546_vm0, %v489_v8 }
 0x199   : > { %566 = vmatpush.bf16.msra.mxu0 %v778_v13  ;;  %579 = vmatpush.bf16.msra.mxu1 %v782_v14 }
 0x19c   : > { %799 = vmatmul.msk.bf16.vlgmr.msra.gmra.mxu0 %vm546_vm0, %v489_v8  ;;  %800 = vmatmul.msk.bf16.vlgmr.msra.gmra.mxu1 %vm546_vm0, %v489_v8 }
 0x219   : > { %v568_v16 = vpop.f32.mrf.mxu0  ;;  %v581_v17 = vpop.f32.mrf.mxu1 }
 0x21a   : > { %v569_v18 = vadd.f32 %v568_v16, %v504_v15  ;;  %v582_v19 = vadd.f32 %v581_v17, %v504_v15 }
 0x21b   : > { %v594_v20 = vpop.f32.mrf.mxu2 }
 0x21c   : > { %606 = vrot.lane.b32.xlu1 %v569_v18, %s1028_s26  ;;  %601 = vrot.lane.b32.xlu0 %v569_v18, %s1027_s17  ;;  %599 = vst.msk [vmem:[%s1169_s27] sm:$0xff] %vm598_vm8, %v569_v18  ;;  %v595_v24 = vadd.f32 %v594_v20, %v504_v15  ;;  %s814_s17 = sshll.u32 %s1081_s16, 4  ;;  %s692_s26 = sshll.u32 %s1169_s27, 4  ;;  %s693_s26 = int_to_ptr.vmem [resolvable:$true] %s692_s26 }
 0x21d   : > { %641 = vrot.lane.b32.xlu2 %v582_v19, %s1029_s28  ;;  %s690_s25 = scalar_lea.hbm %s1228_s3, %s814_s17  ;;  %s679_s16 = scalar_lea.sflag [#allocation6], %s176_s24 }
 0x21e   : > { %s694_s28 = sshll.u32 %s690_s25, 4  ;;  %s695_s28 = int_to_ptr.hbm [resolvable:$true] %s694_s28 }
 0x221   : > { %v570_v21 = vpop.f32.mrf.mxu0  ;;  %v583_v22 = vpop.f32.mrf.mxu1 }
 0x223   : > { %v596_v23 = vpop.f32.mrf.mxu2 }
 0x224   : > { %649 = vrot.lane.b32.xlu1 %v582_v19, %s1021_s6  ;;  %645 = vrot.lane.b32.xlu0 %v582_v19, %s1026_s11  ;;  %s1037_s6 = smov 116   ;;  %s1039_s11 = smov 98  }
 0x225   : > { %611 = vrot.lane.b32.xlu2 %v569_v18, %s1030_s29  ;;  %s948_s29 = sshra.s32 %s695_s28, 4  ;;  %s949_s29 = int_to_ptr.hbm [resolvable:$true] %s948_s29 }
 0x226   : > { %p955_p3 = scmp.lt.s32.totalorder %s949_s29, %s1228_s3 }
 0x22c   : > { %616 = vrot.lane.b32.xlu1 %v569_v18, %s1031_s30  ;;  %653 = vrot.lane.b32.xlu0 %v582_v19, %s1032_s4  ;;  %s950_s30 = scalar_lea.hbm %s949_s29, 16 }
 0x22d   : > { %657 = vrot.lane.b32.xlu2 %v582_v19, %s1033_s5  ;;  %p951_p0 = scmp.ne.s32.totalorder %s949_s29, %s950_s30 }
 0x22f   : > { %p952_p1 = pnand %p951_p0, %p1098_p5 }
 0x231   : > { %p953_p2 = pneg %p952_p1 }
 0x234   : > { %661 = vrot.lane.b32.xlu1 %v582_v19, %s1034_s7  ;;  %621 = vrot.lane.b32.xlu0 %v569_v18, %s1035_s8  ;;  %s954_s7 = scalar_lea.hbm %s1228_s3, 32 }
 0x235   : > { %666 = vrot.lane.b32.xlu2 %v582_v19, %s1036_s9  ;;  %p956_p4 = scmp.lt.s32.totalorder %s954_s7, %s950_s30 }
 0x237   : > { %p957_p7 = por %p956_p4, %p955_p3 }
 0x239   : > { %p958_p8 = pnand %p957_p7, %p953_p2 }
 0x23c   : > { %626 = vrot.lane.b32.xlu1 %v569_v18, %s1037_s6  ;;  %668 = vrot.lane.b32.xlu0 %v595_v24, %s1036_s9 }
 0x23d   : > { %632 = vrot.lane.b32.xlu2 %v569_v18, %s1038_s10 }
 0x244   : > { %674 = vrot.lane.b32.xlu1 %v595_v24, %s1039_s11  ;;  %634 = vrot.lane.b32.xlu0 %v582_v19, %s1038_s10 }
 0x277   : > { %v642_v25 = vpop.permute.xlu2 %641 }
 0x278   : > { %644 = vst.msk [vmem:[%s1169_s27 + $0x8] sm:$0xff] %vm598_vm8, %v642_v25 }
 0x27f   : > { %v612_v28 = vpop.permute.xlu2 %611 }
 0x287   : > { %v658_v33 = vpop.permute.xlu2 %657 }
 0x28e   : > { %v607_v26 = vpop.permute.xlu1 %606  ;;  %v602_v27 = vpop.permute.xlu0 %601 }
 0x28f   : > { %605 = vst.msk [vmem:[%s1169_s27] sm:$0xff] %vm604_vm9, %v602_v27  ;;  %v667_v36 = vpop.permute.xlu2 %666 }
 0x290   : > { %610 = vst.msk [vmem:[%s1169_s27] sm:$0xff] %vm609_vm10, %v607_v26 }
 0x291   : > { %615 = vst.msk [vmem:[%s1169_s27] sm:$0xff] %vm614_vm11, %v612_v28 }
 0x296   : > { %v650_v29 = vpop.permute.xlu1 %649  ;;  %v646_v30 = vpop.permute.xlu0 %645 }
 0x297   : > { %648 = vst.msk [vmem:[%s1169_s27 + $0x8] sm:$0xff] %vm604_vm9, %v646_v30  ;;  %v633_v40 = vpop.permute.xlu2 %632 }
 0x298   : > { %652 = vst.msk [vmem:[%s1169_s27 + $0x8] sm:$0xff] %vm609_vm10, %v650_v29 }
 0x29e   : > { %v617_v31 = vpop.permute.xlu1 %616  ;;  %v654_v32 = vpop.permute.xlu0 %653 }
 0x29f   : > { %620 = vst.msk [vmem:[%s1169_s27] sm:$0xff] %vm619_vm12, %v617_v31 }
 0x2a0   : > { %656 = vst.msk [vmem:[%s1169_s27 + $0x8] sm:$0xff] %vm614_vm11, %v654_v32 }
 0x2a1   : > { %660 = vst.msk [vmem:[%s1169_s27 + $0x8] sm:$0xff] %vm619_vm12, %v658_v33 }
 0x2a6   : > { %v662_v34 = vpop.permute.xlu1 %661  ;;  %v622_v35 = vpop.permute.xlu0 %621 }
 0x2a7   : > { %664 = vst.msk [vmem:[%s1169_s27 + $0x8] sm:$0xff] %vm624_vm13, %v662_v34 }
 0x2a8   : > { %625 = vst.msk [vmem:[%s1169_s27] sm:$0xff] %vm624_vm13, %v622_v35 }
 0x2ae   : > { %v627_v37 = vpop.permute.xlu1 %626  ;;  %v669_v38 = vpop.permute.xlu0 %668 }
 0x2af   : > { %630 = vst.msk [vmem:[%s1169_s27] sm:$0xff] %vm629_vm14, %v627_v37  ;;  %v671_v39 = vsel %vm670_vm15, %v667_v36, %v669_v38 }
 0x2b0   : > { %673 = vst.msk [vmem:[%s1169_s27 + $0x8] sm:$0xff] %vm629_vm14, %v671_v39 }
 0x2b6   : > { %v675_v41 = vpop.permute.xlu1 %674  ;;  %v635_v42 = vpop.permute.xlu0 %634 }
 0x2b7   : > { %677 = vst.msk [vmem:[%s1169_s27 + $0x8] sm:$0xff] %vm639_vm1, %v675_v41  ;;  %v637_v43 = vsel %vm636_vm2, %v633_v40, %v635_v42 }
 0x2b8   : > { %640 = vst.msk [vmem:[%s1169_s27] sm:$0xff] %vm639_vm1, %v637_v43 }
 0x2b9   : > { %961 = shalt.err (!%p958_p8)
}
 0x2ba   : > { %819 = dma.vmem_to_hbm [thread:$0]  (%p1098_p5), %s693_s26, 256, %s695_s28, %s679_s16  }
 0x2bb PF: > { %p831_p9 = scmp.ge.s32.totalorder %s1000_s15, 2  ;;  %s706_s24 = sand.u32 1, %s988_s12  }
 0x2bc   : > { %s707_s27 = scalar_lea.sflag [#allocation6], %s706_s24 }
 0x2bd   : > { %p826_p10 = pnand %p831_p9, %p1102_p6 }
 0x2bf   : > { %p827_p11 = pneg %p826_p10 }
 0x2c1   : > { %983 = dma.done.wait (%p827_p11), %s707_s27, 256  }
 0x2c2   : > { %985 = vsyncadd (%p827_p11), %s707_s27, 4294967040  ;;  %p14_p12 = scmp.ge.s32.totalorder %s1085_s18, 4   ;;  %s1231_s12 = smov %s992_s13 }
 0x2c3   : > { %s1232_s13 = smov %s996_s14  ;;  %s1233_s14 = smov %s1096_s21 }
 0x2c4   : > { %s1234_s15 = smov %s1085_s18  ;;  %16 = sbr.rel (!%p14_p12) target bundleno = 4 (0x4), region = 76 }
 0x2c9   :  { %713 = vsyncpa [#allocation5], 1 }
 0x2ca   :  { %715 = vsyncpa [#allocation5 + $0x1], 1 }
 0x2cb   :  { %716 = vsyncpa [#allocation6], 1 }
 0x2cc   :  { %718 = vsyncpa [#allocation6 + $0x1], 1 }

</bundles_post_ra>
